<compile_context>
chip_gen: v6e
topology: v6e:2x2x1
jax: 0.10.0
libtpu: 0.0.40
codegen_flags: <defaults>
</compile_context>

<pallas_src>
import jax
import jax.numpy as jnp
from jax.experimental import pallas as pl
from jax.experimental.pallas import tpu as pltpu


def _pos_enc_kernel(w_ref, h_ref, o_ref):
    # w_ref: (w, dim)        full width-positional table (resident every step)
    # h_ref: (block_h, dim)  this step's rows of the height-positional table
    # o_ref: (block_h, w, dim)
    out = h_ref[...][:, None, :] + w_ref[...][None, :, :]
    o_ref[...] = out.astype(o_ref.dtype)


def learned_2d_positional_encoding(w_pos, h_pos, *, out_dtype=None, block_h=None):
    """w_pos: (w, dim), h_pos: (h, dim) -> (h * w, dim)."""
    w, dim = w_pos.shape
    h, dim_h = h_pos.shape
    assert dim == dim_h, (dim, dim_h)
    out_dtype = out_dtype or w_pos.dtype

    if block_h is None:
        # Target ~2 MiB output blocks (double-buffered -> ~4 MiB), safe on all
        # generations including v7x's 64 MiB VMEM.  Small problems -> one shot.
        row_bytes = w * dim * jnp.dtype(out_dtype).itemsize
        rows = max(1, (2 * 1024 * 1024) // max(row_bytes, 1))
        block_h = max(8, (rows // 8) * 8)       # sublane-legal multiple of 8
    block_h = min(block_h, h)
    if block_h < h and block_h % 8 != 0:
        # h_pos block (block_h, dim): second-minor must be a multiple of 8
        # unless it covers the full h.
        block_h = max(8, (block_h // 8) * 8)
    if block_h >= h:
        block_h = h                             # single-shot: full-array blocks

    grid = (pl.cdiv(h, block_h),)

    out3 = pl.pallas_call(
        _pos_enc_kernel,
        out_shape=jax.ShapeDtypeStruct((h, w, dim), out_dtype),
        grid_spec=pltpu.PrefetchScalarGridSpec(
            num_scalar_prefetch=0,
            grid=grid,
            in_specs=[
                # Full w_pos resident every step (constant block index -> no re-fetch).
                pl.BlockSpec((w, dim), lambda i: (0, 0)),
                # block_h rows of h_pos per step (no in-kernel dynamic slice).
                pl.BlockSpec((block_h, dim), lambda i: (i, 0)),
            ],
            # Trailing dims are the full (w, dim), legal for any w / dim.
            out_specs=pl.BlockSpec((block_h, w, dim), lambda i: (i, 0, 0)),
        ),
        compiler_params=pltpu.CompilerParams(
            dimension_semantics=("parallel",),
        ),
    )(w_pos, h_pos)

    # Row-major contiguous reshape (free): row index = y * w + x, matching the
    # PyTorch broadcast + .view(h * w, -1).
    return out3.reshape(h * w, dim)


def init_params(key, dim, w, h, dtype=jnp.float32):
    # trunc_normal_(std=0.02), truncated at +/- 2 (deterministic synthetic init).
    kw, kh = jax.random.split(key)
    w_pos = (jax.random.truncated_normal(kw, -2.0, 2.0, (w, dim)) * 0.02).astype(dtype)
    h_pos = (jax.random.truncated_normal(kh, -2.0, 2.0, (h, dim)) * 0.02).astype(dtype)
    return w_pos, h_pos


if __name__ == "__main__":
    dim, w, h = 32, 8, 8
    key = jax.random.PRNGKey(0)
    w_pos, h_pos = init_params(key, dim, w, h)

    out = jax.block_until_ready(learned_2d_positional_encoding(w_pos, h_pos))

    # Reference check (pure JAX, mirrors the PyTorch broadcast + view).
    ref = (w_pos[None, :, :] + h_pos[:, None, :]).reshape(h * w, dim)
    assert out.shape == (h * w, dim)
    assert jnp.allclose(out, ref, atol=1e-6), "mismatch vs reference"

    print("KERNEL_OK")
</pallas_src>

<mosaic_0001>
module attributes {stable_mosaic.version = 11 : i64} {
  func.func @_pos_enc_kernel(%arg0: i32, %arg1: memref<8x32xf32, #tpu.memory_space<vmem>>, %arg2: memref<8x32xf32, #tpu.memory_space<vmem>>, %arg3: memref<8x8x32xf32, #tpu.memory_space<vmem>>) attributes {dimension_semantics = [#tpu.dimension_semantics<parallel>], iteration_bounds = array<i64: 1>, scalar_prefetch = 0 : i64, scratch_operands = 0 : i64, tpu.core_type = #tpu.core_type<tc>, window_params = [{pipeline_mode = #tpu.pipeline_mode<synchronous>, transform_indices = @transform_0, window_bounds = array<i64: 8, 32>}, {transform_indices = @transform_1, window_bounds = array<i64: 8, 32>}, {transform_indices = @transform_2, window_bounds = array<i64: 8, 8, 32>}]} {
    %c0 = arith.constant 0 : index
    %c0_0 = arith.constant 0 : index
    %0 = vector.load %arg2[%c0, %c0_0] : memref<8x32xf32, #tpu.memory_space<vmem>>, vector<8x32xf32>
    %1 = vector.shape_cast %0 : vector<8x32xf32> to vector<8x1x32xf32>
    %c0_1 = arith.constant 0 : index
    %c0_2 = arith.constant 0 : index
    %2 = vector.load %arg1[%c0_1, %c0_2] : memref<8x32xf32, #tpu.memory_space<vmem>>, vector<8x32xf32>
    %3 = vector.shape_cast %2 : vector<8x32xf32> to vector<1x8x32xf32>
    %4 = vector.broadcast %1 : vector<8x1x32xf32> to vector<8x8x32xf32>
    %5 = vector.broadcast %3 : vector<1x8x32xf32> to vector<8x8x32xf32>
    %6 = arith.addf %4, %5 : vector<8x8x32xf32>
    %c0_3 = arith.constant 0 : index
    %c0_4 = arith.constant 0 : index
    %c0_5 = arith.constant 0 : index
    %7 = vector.load %arg3[%c0_3, %c0_4, %c0_5] : memref<8x8x32xf32, #tpu.memory_space<vmem>>, vector<8x8x32xf32>
    tpu.vector_store %arg3[%c0_3, %c0_4, %c0_5], %6 {strides = array<i32>} : memref<8x8x32xf32, #tpu.memory_space<vmem>>, vector<8x8x32xf32>,
    return
  }
  func.func @transform_0(%arg0: i32) -> (i32, i32) {
    %c0_i32 = arith.constant 0 : i32
    %c0_i32_0 = arith.constant 0 : i32
    %c0_i32_1 = arith.constant 0 : i32
    return %c0_i32, %c0_i32_0 : i32, i32
  }
  func.func @transform_1(%arg0: i32) -> (i32, i32) {
    %c0_i32 = arith.constant 0 : i32
    %c0_i32_0 = arith.constant 0 : i32
    return %arg0, %c0_i32 : i32, i32
  }
  func.func @transform_2(%arg0: i32) -> (i32, i32, i32) {
    %c0_i32 = arith.constant 0 : i32
    %c0_i32_0 = arith.constant 0 : i32
    %c0_i32_1 = arith.constant 0 : i32
    return %arg0, %c0_i32, %c0_i32_0 : i32, i32, i32
  }
}

</mosaic_0001>

<bundles_post_ra>
// kernel: tpu_custom_call.1
= control target key start
LH: loop header
LB: loop body
LE: loop exit
PB: predicated region body
PF: predicated region fallthrough
CT: control target
= control target key end

     0   :  { %7 = vsyncpa [#allocation3], 0  ;;  %s273_s0 = inlined_call_operand.hbm [shape: f32[8,32], index: 0, kind: input, shape index: {}]   ;;  %s274_s1 = inlined_call_operand.hbm [shape: f32[8,32], index: 1, kind: input, shape index: {}]   ;;  %s275_s2 = inlined_call_operand.hbm [shape: f32[8,8,32], index: 2, kind: output, shape index: {}]  }
   0x1   :  { %8 = vsyncpa [#allocation6], 0 }
   0x2   :  { %9 = vsyncpa [#allocation4], 0  ;;  %s235_s9 = smov [#allocation2]   ;;  %s236_s11 = smov [#allocation5]  }
   0x3   :  { %s16_s10 = sshll.u32 %s235_s9, 4  ;;  %s26_s12 = sshll.u32 %s236_s11, 4  ;;  %s17_s10 = int_to_ptr.vmem [resolvable:$true] %s16_s10  ;;  %s27_s12 = int_to_ptr.vmem [resolvable:$true] %s26_s12 }
   0x4   :  { %s177_s13 = scalar_lea.vmem %s17_s10, 128  ;;  %p182_p1 = scmp.lt.s32.totalorder %s17_s10, %s17_s10 }
   0x5   :  { %p178_p0 = scmp.ne.s32.totalorder %s17_s10, %s177_s13  ;;  %p183_p2 = scmp.lt.s32.totalorder %s177_s13, %s177_s13 }
   0x7   :  { %p184_p3 = por %p183_p2, %p182_p1 }
   0x9   :  { %p185_p4 = pnand %p184_p3, %p178_p0 }
   0xb   :  { %188 = shalt.err (!%p185_p4)
}
   0xc   :  { %19 = dma.hbm_to_vmem [thread:$0]  %s273_s0, 128, %s17_s10, [#allocation3]  }
   0xd   :  { %s197_s16 = scalar_lea.vmem %s27_s12, 128  ;;  %p202_p6 = scmp.lt.s32.totalorder %s27_s12, %s27_s12 }
   0xe   :  { %p198_p5 = scmp.ne.s32.totalorder %s27_s12, %s197_s16  ;;  %p203_p7 = scmp.lt.s32.totalorder %s197_s16, %s197_s16 }
  0x10   :  { %p204_p8 = por %p203_p7, %p202_p6 }
  0x12   :  { %p205_p9 = pnand %p204_p8, %p198_p5 }
  0x14   :  { %208 = shalt.err (!%p205_p9)
}
  0x15   :  { %29 = dma.hbm_to_vmem [thread:$0]  %s274_s1, 128, %s27_s12, [#allocation6]  }
  0x16   :  { %229 = dma.done.wait [#allocation3], 128  }
  0x17   :  { %230 = vsyncadd [#allocation3], 4294967168 }
  0x18   :  { %231 = dma.done.wait [#allocation6], 128  }
  0x19   :  { %232 = vsyncadd [#allocation6], 4294967168  ;;  %v42_v0 = vlaneseq  ;;  %v237_v1 = vmov 1966171168   ;;  %v36_v6 = vld [vmem:[#allocation5] sm:$0xff]  ;;  %v87_v13 = vld [vmem:[#allocation2] sm:$0xff] }
  0x1a   :  { %v40_v2 = vunpack.c.l.s4 %v237_v1  ;;  %v38_v9 = vcombine.high %v36_v6, %v36_v6  ;;  %vm136_vm0 = vcmask 261120   ;;  %s238_s0 = smov [#allocation7]  }
  0x1b   :  { %v43_v3 = vshrl.u32 %v42_v0, 7  ;;  %s150_s1 = sshll.u32 %s238_s0, 4  ;;  %s151_s1 = int_to_ptr.vmem [resolvable:$true] %s150_s1 }
  0x1c   :  { %v41_v4 = vunpack.c.0.s8 %v40_v2  ;;  %s209_s19 = scalar_lea.vmem %s151_s1, 1024  ;;  %p214_p11 = scmp.lt.s32.totalorder %s151_s1, %s151_s1 }
  0x1d   :  { %v90_v8 = vsub.s32 0, %v43_v3  ;;  %p210_p10 = scmp.ne.s32.totalorder %s151_s1, %s209_s19  ;;  %p215_p12 = scmp.lt.s32.totalorder %s209_s19, %s209_s19 }
  0x1e   :  { %v44_v5 = vsub.s32 %v41_v4, %v43_v3 }
  0x1f   :  { %p216_p13 = por %p215_p12, %p214_p11 }
  0x20   :  { %v45_v7 = vrot.slane %v36_v6, %v44_v5  ;;  %v52_v12 = vrot.slane %v38_v9, %v44_v5 }
  0x21   :  { %p217_p0 = pnand %p216_p13, %p210_p10 }
  0x22   :  { %v61_v10 = vrot.slane %v45_v7, %v44_v5  ;;  %v53_v11 = vcombine.high %v45_v7, %v45_v7  ;;  %v68_v17 = vrot.slane %v52_v12, %v44_v5  ;;  %v54_v18 = vcombine.high %v52_v12, %v52_v12 }
  0x24   :  { %v91_v14 = vrot.slane %v61_v10, %v90_v8  ;;  %v75_v15 = vrot.slane %v53_v11, %v44_v5  ;;  %v83_v16 = vcombine.high %v61_v10, %v61_v10  ;;  %v107_v23 = vrot.slane %v68_v17, %v90_v8 }
  0x25   :  { %v82_v24 = vrot.slane %v54_v18, %v44_v5  ;;  %v84_v25 = vcombine.high %v68_v17, %v68_v17 }
  0x26   :  { %v128_v19 = vadd.f32 %v91_v14, %v87_v13  ;;  %v95_v20 = vrot.slane %v75_v15, %v90_v8  ;;  %v99_v21 = vrot.slane %v83_v16, %v90_v8  ;;  %v85_v22 = vcombine.high %v75_v15, %v75_v15 }
  0x27   :  { %v132_v29 = vadd.f32 %v107_v23, %v87_v13  ;;  %v111_v30 = vrot.slane %v82_v24, %v90_v8  ;;  %v115_v31 = vrot.slane %v84_v25, %v90_v8  ;;  %v86_v32 = vcombine.high %v82_v24, %v82_v24 }
  0x28   :  { %137 = vst.msk [vmem:[#allocation7] sm:$0xff] %vm136_vm0, %v128_v19  ;;  %v129_v26 = vadd.f32 %v95_v20, %v87_v13  ;;  %v130_v27 = vadd.f32 %v99_v21, %v87_v13  ;;  %v103_v28 = vrot.slane %v85_v22, %v90_v8 }
  0x29   :  { %141 = vst.msk [vmem:[#allocation7 + $0x20] sm:$0xff] %vm136_vm0, %v132_v29  ;;  %v133_v34 = vadd.f32 %v111_v30, %v87_v13  ;;  %v134_v35 = vadd.f32 %v115_v31, %v87_v13  ;;  %v119_v36 = vrot.slane %v86_v32, %v90_v8 }
  0x2a   :  { %138 = vst.msk [vmem:[#allocation7 + $0x8] sm:$0xff] %vm136_vm0, %v129_v26  ;;  %139 = vst.msk [vmem:[#allocation7 + $0x10] sm:$0xff] %vm136_vm0, %v130_v27  ;;  %v131_v33 = vadd.f32 %v103_v28, %v87_v13 }
  0x2b   :  { %142 = vst.msk [vmem:[#allocation7 + $0x28] sm:$0xff] %vm136_vm0, %v133_v34  ;;  %143 = vst.msk [vmem:[#allocation7 + $0x30] sm:$0xff] %vm136_vm0, %v134_v35  ;;  %v135_v37 = vadd.f32 %v119_v36, %v87_v13 }
  0x2c   :  { %140 = vst.msk [vmem:[#allocation7 + $0x18] sm:$0xff] %vm136_vm0, %v131_v33 }
  0x2d   :  { %144 = vst.msk [vmem:[#allocation7 + $0x38] sm:$0xff] %vm136_vm0, %v135_v37 }
  0x2e   :  { %220 = shalt.err (!%p217_p0)
}
  0x2f   :  { %s239_s20 = smov 128   ;;  %s240_s21 = smov 8  }
  0x30   :  { %156 = dma.vmem_to_hbm [thread:$0]  %s151_s1, 1024, %s275_s2, [#allocation4], %s239_s20, %s239_s20, %s240_s21  }
  0x31   :  { %233 = dma.done.wait [#allocation4], 1024  }
  0x32   :  { %234 = vsyncadd [#allocation4], 4294966272 }
  0x33   :  { %160 = vsyncpa [#allocation3], 1 }
  0x34   :  { %161 = vsyncpa [#allocation6], 1 }
  0x35   :  { %162 = vsyncpa [#allocation4], 1 }

</bundles_post_ra>
